<compile_context>
chip_gen: v7x
topology: tpu7x:2x2x1
jax: 0.10.0
libtpu: 0.0.40
codegen_flags: <defaults>
</compile_context>

<pallas_src>
import functools

import numpy as np
import jax
import jax.numpy as jnp
from jax import lax
from jax.experimental import pallas as pl
from jax.experimental.pallas import tpu as pltpu


# ----------------------------- in-kernel helpers -----------------------------

def _erf(x):
    # float32 erf approximation (Abramowitz & Stegun 7.1.26, |err| < 1.5e-7),
    # built only from ops guaranteed to lower in Mosaic.  The divide goes to the
    # EUP via pl.reciprocal (free slot relative to the VPU).
    a1, a2, a3, a4, a5 = 0.254829592, -0.284496736, 1.421413741, -1.453152027, 1.061405429
    p = 0.3275911
    s = jnp.where(x >= 0.0, 1.0, -1.0)
    ax = jnp.abs(x)
    t = pl.reciprocal(1.0 + p * ax, approx=True)
    poly = ((((a5 * t + a4) * t + a3) * t + a2) * t + a1) * t
    return s * (1.0 - poly * jnp.exp(-ax * ax))


def _gelu(x):
    # torch.nn.GELU() default (exact, erf-based).
    return 0.5 * x * (1.0 + _erf(x * 0.7071067811865476))


# ------------------- kernel 1: separable bicubic x2 upsample ------------------

def _upsample_kernel(x_ref, ah_ref, awt_ref, o_ref, *, cx):
    # x_ref:   (1, cx, h, w)    ah_ref: (2h, h)    awt_ref: (w, 2w)
    # o_ref:   (1, cx, 2h, 2w)
    x = x_ref[0]                                   # (cx, h, w)
    h, w = x.shape[1], x.shape[2]
    H2, W2 = ah_ref.shape[0], awt_ref.shape[1]

    # W-direction: batched matmul  (cx, h, w) @ (w, 2w)  -> (cx, h, 2w)
    awt_b = jnp.broadcast_to(awt_ref[...], (cx, w, W2))
    t1 = lax.dot_general(x, awt_b, (((2,), (1,)), ((0,), (0,))),
                         preferred_element_type=jnp.float32)
    # H-direction: batched matmul  (2h, h) @ (cx, h, 2w) -> (cx, 2h, 2w)
    ah_b = jnp.broadcast_to(ah_ref[...], (cx, H2, h))
    t2 = lax.dot_general(ah_b, t1, (((2,), (1,)), ((0,), (0,))),
                         preferred_element_type=jnp.float32)
    o_ref[0] = t2


def bicubic_upsample(x, ah, awt):
    B, cx, h, w = x.shape
    H2, W2 = 2 * h, 2 * w
    kernel = functools.partial(_upsample_kernel, cx=cx)
    return pl.pallas_call(
        kernel,
        out_shape=jax.ShapeDtypeStruct((B, cx, H2, W2), jnp.float32),
        grid=(B,),
        in_specs=[
            pl.BlockSpec((1, cx, h, w), lambda b: (b, 0, 0, 0)),
            pl.BlockSpec((H2, h), lambda b: (0, 0)),
            pl.BlockSpec((w, W2), lambda b: (0, 0)),
        ],
        out_specs=pl.BlockSpec((1, cx, H2, W2), lambda b: (b, 0, 0, 0)),
        compiler_params=pltpu.CompilerParams(dimension_semantics=("parallel",)),
    )(x, ah, awt)


# -------------- kernel 2: fused ECDF block (per batch element) ----------------

def _ecdf_kernel(xup_ref, skip_ref, w1_ref, b1_ref, taps_ref, dwb_ref,
                 w2_ref, b2_ref, out_ref, stages_ref, *, c, n_stage, H2, W2, add):
    # xup_ref/skip_ref: (1, cx, L) / (1, cs, L)   channel-first, L = H2*W2 lanes
    # w1_ref: (2c, c1)  rows = [even-chain ch | odd-chain ch], BN scale folded
    # b1_ref: (2c, 1)
    # taps_ref: (n_stage, 2c, 9) depthwise taps, BN scale folded
    # dwb_ref:  (n_stage, 2c, 1) depthwise BN shifts
    # w2_ref: (c2, 2*(n_stage+1)*c)  columns permuted to the chain scratch order,
    #         BN scale folded;   b2_ref: (c2, 1)
    # out_ref: (1, c2, L)
    # stages_ref: VMEM scratch (2*(n_stage+1)*c, L) holding every chain stage.
    L = H2 * W2
    xup = xup_ref[0]
    skp = skip_ref[0]
    xcat = jnp.concatenate([xup, skp], axis=0)                     # (c1, L)

    # ---- pwconv1: 1x1 conv (+ folded BN) + GELU; result stays in VMEM ----
    y = jnp.dot(w1_ref[...], xcat, preferred_element_type=jnp.float32) + b1_ref[...]
    cur = _gelu(y)                                                 # (2c, L)

    # ---- border-validity masks for the flattened 3x3 stencil (hoisted) ----
    col = lax.broadcasted_iota(jnp.int32, (1, L), 1)
    wpos = col % W2
    hpos = col // W2
    neigh = [(dy, dx) for dy in (-1, 0, 1) for dx in (-1, 0, 1)
             if not (dy == 0 and dx == 0)]
    masks = {}
    for dy, dx in neigh:
        conds = []
        if dy == -1:
            conds.append(hpos > 0)
        if dy == 1:
            conds.append(hpos < H2 - 1)
        if dx == -1:
            conds.append(wpos > 0)
        if dx == 1:
            conds.append(wpos < W2 - 1)
        m = conds[0]
        for cnd in conds[1:]:
            m = jnp.logical_and(m, cnd)
        masks[(dy, dx)] = m

    # ---- 15 shared DWConv3x3 + BN stages, even & odd chains together ----
    stages_ref[0:2 * c, :] = cur
    for s in range(n_stage):                       # serial dependency: unrolled
        taps_s = taps_ref[s]                       # (2c, 9)
        acc = taps_s[:, 4:5] * cur                 # centre tap
        for dy, dx in neigh:
            k = (dy + 1) * 3 + (dx + 1)
            shift = (-(dy * W2 + dx)) % L          # rolled[i] = cur[i + dy*W2 + dx]
            nbr = pltpu.roll(cur, shift=shift, axis=1)
            nbr = jnp.where(masks[(dy, dx)], nbr, 0.0)
            acc = acc + taps_s[:, k:k + 1] * nbr
        cur = acc + dwb_ref[s]                     # BN (scale folded), act=False
        stages_ref[(s + 1) * 2 * c:(s + 2) * 2 * c, :] = cur

    # ---- pwconv2: 1x1 conv (+ folded BN) + GELU ----
    y2 = jnp.dot(w2_ref[...], stages_ref[...],
                 preferred_element_type=jnp.float32) + b2_ref[...]
    y2 = _gelu(y2)
    # TODO(synk): ECA_Spatial_Attention (self.se_att) is not defined in the
    # reference source; it is treated as identity here.

    if add:
        out_ref[0] = y2 + xcat                     # residual (c1 == c2)
    else:
        out_ref[0] = y2


def ecdf_fused(xup_f, skip_f, params, H2, W2):
    B, cx, L = xup_f.shape
    _, cs, _ = skip_f.shape
    c1 = cx + cs
    w1, b1 = params["w1p"], params["b1p"]
    taps, dwb = params["taps"], params["dwb"]
    w2, b2 = params["w2p"], params["b2p"]
    n_stage, c, add = params["n_stage"], params["c"], params["add"]
    c2 = w2.shape[0]
    assert w1.shape[1] == c1
    assert (not add) or (c1 == c2)

    kernel = functools.partial(_ecdf_kernel, c=c, n_stage=n_stage,
                               H2=H2, W2=W2, add=add)
    return pl.pallas_call(
        kernel,
        out_shape=jax.ShapeDtypeStruct((B, c2, L), jnp.float32),
        grid=(B,),
        in_specs=[
            pl.BlockSpec((1, cx, L), lambda b: (b, 0, 0)),
            pl.BlockSpec((1, cs, L), lambda b: (b, 0, 0)),
            pl.BlockSpec(w1.shape, lambda b: (0, 0)),
            pl.BlockSpec(b1.shape, lambda b: (0, 0)),
            pl.BlockSpec(taps.shape, lambda b: (0, 0, 0)),
            pl.BlockSpec(dwb.shape, lambda b: (0, 0, 0)),
            pl.BlockSpec(w2.shape, lambda b: (0, 0)),
            pl.BlockSpec(b2.shape, lambda b: (0, 0)),
        ],
        out_specs=pl.BlockSpec((1, c2, L), lambda b: (b, 0, 0)),
        scratch_shapes=[pltpu.VMEM((2 * (n_stage + 1) * c, L), jnp.float32)],
        compiler_params=pltpu.CompilerParams(dimension_semantics=("parallel",)),
    )(xup_f, skip_f, w1, b1, taps, dwb, w2, b2)


# --------------------------- parameters / operators ---------------------------

def bicubic_upsample_matrix(n):
    """1-D operator for scale_factor=2 bicubic interpolation (align_corners=False,
    A=-0.75, border-clamped), matching torch.nn.functional.interpolate."""
    A = -0.75

    def cc1(t):
        return ((A + 2.0) * t - (A + 3.0)) * t * t + 1.0

    def cc2(t):
        return ((A * t - 5.0 * A) * t + 8.0 * A) * t - 4.0 * A

    m = np.zeros((2 * n, n), dtype=np.float32)
    for j in range(2 * n):
        src = (j + 0.5) * 0.5 - 0.5
        fl = int(np.floor(src))
        t = src - fl
        wts = (cc2(t + 1.0), cc1(t), cc1(1.0 - t), cc2(2.0 - t))
        for k in range(4):
            idx = min(max(fl - 1 + k, 0), n - 1)
            m[j, idx] += wts[k]
    return m


def make_params(in_channels, out_channels, h, w, key):
    c1, c2 = in_channels, out_channels
    N, e = 32, 0.5
    cp = c2 // N                       # pwconv1 output channels  (c2 // 32)
    c = int(c2 * e / N)                # per-chain channel count  (c2 // 64)
    n_stage = (N - 2) // 2             # number of shared DWConv modules (15)
    assert c >= 1 and cp == 2 * c, "out_channels must be a multiple of 64"
    eps = 1e-3                         # BatchNorm eps in the reference Conv block
    ks = jax.random.split(key, 6)

    def bn_fold(k, n):
        kg, kb, km, kv = jax.random.split(k, 4)
        gamma = jax.random.uniform(kg, (n,), jnp.float32, 0.5, 1.5)
        beta = 0.1 * jax.random.normal(kb, (n,), jnp.float32)
        mean = 0.1 * jax.random.normal(km, (n,), jnp.float32)
        var = jax.random.uniform(kv, (n,), jnp.float32, 0.5, 1.5)
        scale = gamma / jnp.sqrt(var + eps)       # inference-mode BN -> affine
        shift = beta - mean * scale
        return scale, shift

    # pwconv1: Conv2d(c1, cp, 1).weight -> (cp, c1); fold BN scale into rows and
    # fold the even/odd channel de-interleave into the row order.
    w1 = 0.1 * jax.random.normal(ks[0], (cp, c1), jnp.float32)
    s1, b1 = bn_fold(ks[1], cp)
    perm1 = np.concatenate([np.arange(0, cp, 2), np.arange(1, cp, 2)])
    w1p = (w1 * s1[:, None])[perm1]
    b1p = b1[perm1].reshape(cp, 1)

    # shared depthwise 3x3 stages: weight (n_stage, c, 3, 3); fold BN scale into
    # the taps; duplicate rows so even and odd chains are processed together.
    dw_w = 0.2 * jax.random.normal(ks[2], (n_stage, c, 3, 3), jnp.float32)
    dws, dwb = bn_fold(ks[3], n_stage * c)
    dws = dws.reshape(n_stage, c)
    dwb = dwb.reshape(n_stage, c)
    taps = dw_w.reshape(n_stage, c, 9) * dws[:, :, None]
    taps2 = jnp.concatenate([taps, taps], axis=1)                  # (n_stage, 2c, 9)
    dwb2 = jnp.concatenate([dwb, dwb], axis=1).reshape(n_stage, 2 * c, 1)

    # pwconv2: Conv2d(c2//2, c2, 1).weight -> (c2, c2//2); fold BN scale into
    # rows and fold the torch.cat(x_even + x_odd) channel order into the column
    # order so the kernel consumes the chain scratch layout directly.
    w2 = 0.1 * jax.random.normal(ks[4], (c2, c2 // 2), jnp.float32)
    s2, b2 = bn_fold(ks[5], c2)
    S1 = n_stage + 1
    col_perm = np.zeros(2 * S1 * c, dtype=np.int64)
    for t in range(S1):
        for j in range(c):
            col_perm[t * 2 * c + j] = t * c + j              # even chain, stage t
            col_perm[t * 2 * c + c + j] = S1 * c + t * c + j  # odd chain, stage t
    w2p = (w2 * s2[:, None])[:, col_perm]
    b2p = b2.reshape(c2, 1)

    # separable bicubic operators
    ah = jnp.asarray(bicubic_upsample_matrix(h))                   # (2h, h)
    awt = jnp.asarray(bicubic_upsample_matrix(w).T)                # (w, 2w)

    return dict(
        ah=ah, awt=awt,
        w1p=w1p, b1p=b1p,
        taps=taps2, dwb=dwb2,
        w2p=w2p, b2p=b2p,
        n_stage=n_stage, c=c, add=(c1 == c2),
    )


# --------------------------------- forward -----------------------------------

def unet_decoder_forward(x, skip, params):
    B, cx, h, w = x.shape
    _, cs, H2, W2 = skip.shape
    assert H2 == 2 * h and W2 == 2 * w

    # 1) F.interpolate(x, scale_factor=2, mode='bicubic', align_corners=False)
    xup = bicubic_upsample(x, params["ah"], params["awt"])         # (B, cx, H2, W2)

    # 2) torch.cat([x, skip], dim=1) + ECDF (pwconv1, 2x15 DWConv+BN chain,
    #    pwconv2, residual) — one fused kernel per batch element in a
    #    channel-first, lane-dense (H2*W2) layout.  The concat, even/odd split
    #    and stage-concat reorders are folded into the weights, so the only
    #    host-side ops are free reshapes.
    # NOTE: the reference forward calls self.cmrf(x) but only self.ecdf exists
    # in __init__; interpreted as the ECDF module.
    L = H2 * W2
    out_f = ecdf_fused(xup.reshape(B, cx, L), skip.reshape(B, cs, L),
                       params, H2, W2)                             # (B, c2, L)
    return out_f.reshape(B, -1, H2, W2)                            # NCHW


# ----------------------------------- main -------------------------------------

if __name__ == "__main__":
    B = 2
    cx, cs = 32, 32                 # channels of x and skip_connection
    h, w = 8, 8                     # x spatial; skip_connection is 2h x 2w
    in_channels = cx + cs           # channels after upsample + concat (ECDF c1)
    out_channels = 64               # ECDF c2 (multiple of 64 so that self.c >= 1)

    key = jax.random.PRNGKey(0)
    kx, ks, kp = jax.random.split(key, 3)
    x = jax.random.normal(kx, (B, cx, h, w), jnp.float32)
    skip = jax.random.normal(ks, (B, cs, 2 * h, 2 * w), jnp.float32)
    params = make_params(in_channels, out_channels, h, w, kp)

    out = unet_decoder_forward(x, skip, params)
    out = jax.block_until_ready(out)
    assert out.shape == (B, out_channels, 2 * h, 2 * w), out.shape
    assert bool(jnp.all(jnp.isfinite(out)))
    print("KERNEL_OK")
</pallas_src>

<mosaic_0001>
module attributes {stable_mosaic.version = 11 : i64} {
  func.func @_upsample_kernel(%arg0: i32, %arg1: memref<1x32x8x8xf32, #tpu.memory_space<vmem>>, %arg2: memref<16x8xf32, #tpu.memory_space<vmem>>, %arg3: memref<8x16xf32, #tpu.memory_space<vmem>>, %arg4: memref<1x32x16x16xf32, #tpu.memory_space<vmem>>) attributes {dimension_semantics = [#tpu.dimension_semantics<parallel>], iteration_bounds = array<i64: 2>, scalar_prefetch = 0 : i64, scratch_operands = 0 : i64, tpu.core_type = #tpu.core_type<tc>, window_params = [{transform_indices = @transform_0, window_bounds = array<i64: 1, 32, 8, 8>}, {pipeline_mode = #tpu.pipeline_mode<synchronous>, transform_indices = @transform_1, window_bounds = array<i64: 16, 8>}, {pipeline_mode = #tpu.pipeline_mode<synchronous>, transform_indices = @transform_2, window_bounds = array<i64: 8, 16>}, {transform_indices = @transform_3, window_bounds = array<i64: 1, 32, 16, 16>}]} {
    %c0 = arith.constant 0 : index
    %c0_0 = arith.constant 0 : index
    %c0_1 = arith.constant 0 : index
    %c0_2 = arith.constant 0 : index
    %0 = vector.load %arg1[%c0, %c0_0, %c0_1, %c0_2] : memref<1x32x8x8xf32, #tpu.memory_space<vmem>>, vector<1x32x8x8xf32>
    %1 = vector.shape_cast %0 : vector<1x32x8x8xf32> to vector<32x8x8xf32>
    %c0_3 = arith.constant 0 : index
    %c0_4 = arith.constant 0 : index
    %2 = vector.load %arg3[%c0_3, %c0_4] : memref<8x16xf32, #tpu.memory_space<vmem>>, vector<8x16xf32>
    %3 = vector.shape_cast %2 : vector<8x16xf32> to vector<1x8x16xf32>
    %4 = vector.broadcast %3 : vector<1x8x16xf32> to vector<32x8x16xf32>
    %cst = arith.constant dense<0.000000e+00> : vector<32x8x16xf32>
    %5 = tpu.matmul %1, %4, %cst {dimension_numbers = #tpu.dot_dimension_numbers<[2], [1], [1], [2], [0, 0, 0, 1, 1, 2], [0], [0]>} : vector<32x8x8xf32>, vector<32x8x16xf32>, vector<32x8x16xf32> -> vector<32x8x16xf32>
    %c0_5 = arith.constant 0 : index
    %c0_6 = arith.constant 0 : index
    %6 = vector.load %arg2[%c0_5, %c0_6] : memref<16x8xf32, #tpu.memory_space<vmem>>, vector<16x8xf32>
    %7 = vector.shape_cast %6 : vector<16x8xf32> to vector<1x16x8xf32>
    %8 = vector.broadcast %7 : vector<1x16x8xf32> to vector<32x16x8xf32>
    %cst_7 = arith.constant dense<0.000000e+00> : vector<32x16x16xf32>
    %9 = tpu.matmul %8, %5, %cst_7 {dimension_numbers = #tpu.dot_dimension_numbers<[2], [1], [1], [2], [0, 0, 0, 1, 1, 2], [0], [0]>} : vector<32x16x8xf32>, vector<32x8x16xf32>, vector<32x16x16xf32> -> vector<32x16x16xf32>
    %c0_8 = arith.constant 0 : index
    %c0_9 = arith.constant 0 : index
    %c0_10 = arith.constant 0 : index
    %c0_11 = arith.constant 0 : index
    %10 = vector.load %arg4[%c0_8, %c0_9, %c0_10, %c0_11] : memref<1x32x16x16xf32, #tpu.memory_space<vmem>>, vector<1x32x16x16xf32>
    %11 = vector.shape_cast %10 : vector<1x32x16x16xf32> to vector<32x16x16xf32>
    %12 = vector.shape_cast %9 : vector<32x16x16xf32> to vector<1x32x16x16xf32>
    tpu.vector_store %arg4[%c0_8, %c0_9, %c0_10, %c0_11], %12 {strides = array<i32>} : memref<1x32x16x16xf32, #tpu.memory_space<vmem>>, vector<1x32x16x16xf32>,
    return
  }
  func.func @transform_0(%arg0: i32) -> (i32, i32, i32, i32) {
    %c0_i32 = arith.constant 0 : i32
    %c0_i32_0 = arith.constant 0 : i32
    %c0_i32_1 = arith.constant 0 : i32
    %c0_i32_2 = arith.constant 0 : i32
    return %arg0, %c0_i32, %c0_i32_0, %c0_i32_1 : i32, i32, i32, i32
  }
  func.func @transform_1(%arg0: i32) -> (i32, i32) {
    %c0_i32 = arith.constant 0 : i32
    %c0_i32_0 = arith.constant 0 : i32
    %c0_i32_1 = arith.constant 0 : i32
    return %c0_i32, %c0_i32_0 : i32, i32
  }
  func.func @transform_2(%arg0: i32) -> (i32, i32) {
    %c0_i32 = arith.constant 0 : i32
    %c0_i32_0 = arith.constant 0 : i32
    %c0_i32_1 = arith.constant 0 : i32
    return %c0_i32, %c0_i32_0 : i32, i32
  }
  func.func @transform_3(%arg0: i32) -> (i32, i32, i32, i32) {
    %c0_i32 = arith.constant 0 : i32
    %c0_i32_0 = arith.constant 0 : i32
    %c0_i32_1 = arith.constant 0 : i32
    %c0_i32_2 = arith.constant 0 : i32
    return %arg0, %c0_i32, %c0_i32_0, %c0_i32_1 : i32, i32, i32, i32
  }
}

</mosaic_0001>

<bundles_post_ra>
// kernel: tpu_custom_call.1
= control target key start
LH: loop header
LB: loop body
LE: loop exit
PB: predicated region body
PF: predicated region fallthrough
CT: control target
= control target key end

     0   :  { %s5698_s12 = smov 0   ;;  %s6186_s0 = inlined_call_operand.vmem [shape: f32[2,32,8,8], index: 0, kind: input, shape index: {}]   ;;  %s6187_s1 = inlined_call_operand.vmem [shape: f32[16,8], index: 1, kind: input, shape index: {}]   ;;  %s6188_s2 = inlined_call_operand.vmem [shape: f32[8,16], index: 2, kind: input, shape index: {}]   ;;  %s6189_s3 = inlined_call_operand.vmem [shape: f32[2,32,16,16], index: 3, kind: output, shape index: {}]  }
   0x1 LB: > { %s5069_s13 = sadd.s32 4294967295, %s5674_s12   ;;  %p5073_p0 = scmp.ge.s32.totalorder %s5674_s12, 1  ;;  %s5674_s12 = sphi %s5698_s12, %s13_s12  }
   0x2   : > { %p137_p1 = scmp.lt.s32.totalorder %s5674_s12, 3 }
   0x4   : > { %p138_p2 = pnand %p5073_p0, %p137_p1 }
   0x5   : > { %v5709_v0 = vld [vmem:[%s6188_s2] sm:$0xff] (!%p138_p2)  ;;  %p161_p3 = scmp.lt.s32.totalorder (!%p138_p2), %s5069_s13, 1  ;;  %v5676_v1 = vmov (!%p138_p2), 0.0   ;;  %vm5677_vm0 = vmmov (!%p138_p2), 0   ;;  %vm204_vm1 = vcmask (!%p138_p2), 64512   ;;  %v5923_v37 = vld [vmem:[%s6187_s1 + $0x8] sm:$0xff] (!%p138_p2) }
   0x6   : > { %141 = sbr.rel (%p138_p2) target bundleno = 505 (0x1f9), region = 32  ;;  %5338 = vmatprep.subr.mxu0 (!%p138_p2), %v5676_v1  ;;  %5343 = vmatprep.subr.mxu1 (!%p138_p2), %v5676_v1  ;;  %v5914_v34 = vld [vmem:[%s6187_s1] sm:$0xff] (!%p138_p2)  ;;  %vm4949_vm2 = vcmask (!%p138_p2), 130048  }
   0x7   : > { %5339 = vmatpush3.msra.mxu0 (!%p138_p2), %v5709_v0  ;;  %5340 = vmatprep.mubr.msk.f32.mxu0 (!%p138_p2), %vm5677_vm0, %v5676_v1 }
   0x8   : > { %5344 = vmatpush3.msra.mxu1 (!%p138_p2), %v5709_v0  ;;  %5345 = vmatprep.mubr.msk.f32.mxu1 (!%p138_p2), %vm5677_vm0, %v5676_v1 }
   0x9   : > { %5348 = vmatprep.subr.mxu0 (!%p138_p2), %v5676_v1  ;;  %5353 = vmatprep.subr.mxu1 (!%p138_p2), %v5676_v1 }
   0xd   : > { %s6191_s13 = smov (!%p161_p3, %s5069_s13), 1 }
   0xe   : > { %s5176_s16 = sshll.u32 %s6191_s13, 8  ;;  %s5177_s24 = sshll.u32 %s6191_s13, 9 }
   0xf   : > { %s5727_s19 = scalar_lea.vmem %s6186_s0, %s5176_s16  ;;  %s6053_s27 = scalar_lea.vmem %s6189_s3, %s5177_s24 }
  0x10   : > { %v171_v2 = vld [vmem:[%s5727_s19] sm:$0xff]  ;;  %v172_v3 = vld [vmem:[%s5727_s19 + $0x8] sm:$0xff]  ;;  %v173_v4 = vld [vmem:[%s5727_s19 + $0x10] sm:$0xff] }
  0x11   : > { %5341 = vmatmul.mubr.msk.f32.vlgmr.msra.gmra.mrb[0].mxu0 %vm204_vm1, %v171_v2  ;;  %5346 = vmatmul.mubr.msk.f32.vlgmr.msra.gmra.mrb[0].mxu1 %vm204_vm1, %v172_v3  ;;  %v174_v5 = vld [vmem:[%s5727_s19 + $0x18] sm:$0xff]  ;;  %v175_v6 = vld [vmem:[%s5727_s19 + $0x20] sm:$0xff]  ;;  %v176_v7 = vld [vmem:[%s5727_s19 + $0x28] sm:$0xff] }
  0x12   : > { %5349 = vmatpush3.msra.mxu0 %v5709_v0  ;;  %5350 = vmatprep.mubr.msk.f32.mxu0 %vm5677_vm0, %v5676_v1  ;;  %v177_v8 = vld [vmem:[%s5727_s19 + $0x30] sm:$0xff]  ;;  %v178_v9 = vld [vmem:[%s5727_s19 + $0x38] sm:$0xff]  ;;  %v179_v10 = vld [vmem:[%s5727_s19 + $0x40] sm:$0xff] }
  0x13   : > { %5354 = vmatpush3.msra.mxu1 %v5709_v0  ;;  %5355 = vmatprep.mubr.msk.f32.mxu1 %vm5677_vm0, %v5676_v1  ;;  %v180_v11 = vld [vmem:[%s5727_s19 + $0x48] sm:$0xff]  ;;  %v181_v12 = vld [vmem:[%s5727_s19 + $0x50] sm:$0xff]  ;;  %v182_v13 = vld [vmem:[%s5727_s19 + $0x58] sm:$0xff] }
  0x14   : > { %5358 = vmatprep.subr.mxu0 %v5676_v1  ;;  %5363 = vmatprep.subr.mxu1 %v5676_v1  ;;  %v183_v14 = vld [vmem:[%s5727_s19 + $0x60] sm:$0xff]  ;;  %v184_v15 = vld [vmem:[%s5727_s19 + $0x68] sm:$0xff]  ;;  %v185_v16 = vld [vmem:[%s5727_s19 + $0x70] sm:$0xff] }
  0x15   : > { %5351 = vmatmul.mubr.msk.f32.vlgmr.msra.gmra.mrb[2].mxu0 %vm204_vm1, %v173_v4  ;;  %5356 = vmatmul.mubr.msk.f32.vlgmr.msra.gmra.mrb[2].mxu1 %vm204_vm1, %v174_v5  ;;  %v186_v17 = vld [vmem:[%s5727_s19 + $0x78] sm:$0xff]  ;;  %v187_v18 = vld [vmem:[%s5727_s19 + $0x80] sm:$0xff]  ;;  %v188_v19 = vld [vmem:[%s5727_s19 + $0x88] sm:$0xff] }
  0x16   : > { %5359 = vmatpush3.msra.mxu0 %v5709_v0  ;;  %5360 = vmatprep.mubr.msk.f32.mxu0 %vm5677_vm0, %v5676_v1  ;;  %v189_v20 = vld [vmem:[%s5727_s19 + $0x90] sm:$0xff]  ;;  %v190_v21 = vld [vmem:[%s5727_s19 + $0x98] sm:$0xff]  ;;  %v191_v22 = vld [vmem:[%s5727_s19 + $0xa0] sm:$0xff] }
  0x17   : > { %5364 = vmatpush3.msra.mxu1 %v5709_v0  ;;  %5365 = vmatprep.mubr.msk.f32.mxu1 %vm5677_vm0, %v5676_v1  ;;  %v192_v23 = vld [vmem:[%s5727_s19 + $0xa8] sm:$0xff]  ;;  %v193_v24 = vld [vmem:[%s5727_s19 + $0xb0] sm:$0xff]  ;;  %v194_v25 = vld [vmem:[%s5727_s19 + $0xb8] sm:$0xff] }
  0x18   : > { %5368 = vmatprep.subr.mxu0 %v5676_v1  ;;  %5373 = vmatprep.subr.mxu1 %v5676_v1  ;;  %v195_v26 = vld [vmem:[%s5727_s19 + $0xc0] sm:$0xff]  ;;  %v196_v27 = vld [vmem:[%s5727_s19 + $0xc8] sm:$0xff]  ;;  %v197_v28 = vld [vmem:[%s5727_s19 + $0xd0] sm:$0xff] }
  0x19   : > { %5361 = vmatmul.mubr.msk.f32.vlgmr.msra.gmra.mrb[4].mxu0 %vm204_vm1, %v175_v6  ;;  %5366 = vmatmul.mubr.msk.f32.vlgmr.msra.gmra.mrb[4].mxu1 %vm204_vm1, %v176_v7  ;;  %v198_v29 = vld [vmem:[%s5727_s19 + $0xd8] sm:$0xff]  ;;  %v199_v30 = vld [vmem:[%s5727_s19 + $0xe0] sm:$0xff]  ;;  %v200_v31 = vld [vmem:[%s5727_s19 + $0xe8] sm:$0xff] }
  0x1a   : > { %5369 = vmatpush3.msra.mxu0 %v5709_v0  ;;  %5370 = vmatprep.mubr.msk.f32.mxu0 %vm5677_vm0, %v5676_v1  ;;  %v201_v32 = vld [vmem:[%s5727_s19 + $0xf0] sm:$0xff]  ;;  %v202_v33 = vld [vmem:[%s5727_s19 + $0xf8] sm:$0xff] }
  0x1b   : > { %5374 = vmatpush3.msra.mxu1 %v5709_v0  ;;  %5375 = vmatprep.mubr.msk.f32.mxu1 %vm5677_vm0, %v5676_v1 }
  0x1c   : > { %5378 = vmatprep.subr.mxu0 %v5676_v1  ;;  %5383 = vmatprep.subr.mxu1 %v5676_v1 }
  0x1d   : > { %5371 = vmatmul.mubr.msk.f32.vlgmr.msra.gmra.mrb[6].mxu0 %vm204_vm1, %v177_v8  ;;  %5376 = vmatmul.mubr.msk.f32.vlgmr.msra.gmra.mrb[6].mxu1 %vm204_vm1, %v178_v9 }
  0x1e   : > { %5379 = vmatpush3.msra.mxu0 %v5709_v0  ;;  %5380 = vmatprep.mubr.msk.f32.mxu0 %vm5677_vm0, %v5676_v1 }
  0x1f   : > { %5384 = vmatpush3.msra.mxu1 %v5709_v0  ;;  %5385 = vmatprep.mubr.msk.f32.mxu1 %vm5677_vm0, %v5676_v1 }
  0x20   : > { %5388 = vmatprep.subr.mxu0 %v5676_v1  ;;  %5393 = vmatprep.subr.mxu1 %v5676_v1 }
  0x21   : > { %5381 = vmatmul.mubr.msk.f32.vlgmr.msra.gmra.mrb[8].mxu0 %vm204_vm1, %v179_v10  ;;  %5386 = vmatmul.mubr.msk.f32.vlgmr.msra.gmra.mrb[8].mxu1 %vm204_vm1, %v180_v11 }
  0x22   : > { %5389 = vmatpush3.msra.mxu0 %v5709_v0  ;;  %5390 = vmatprep.mubr.msk.f32.mxu0 %vm5677_vm0, %v5676_v1 }
  0x23   : > { %5394 = vmatpush3.msra.mxu1 %v5709_v0  ;;  %5395 = vmatprep.mubr.msk.f32.mxu1 %vm5677_vm0, %v5676_v1 }
  0x24   : > { %5398 = vmatprep.subr.mxu0 %v5676_v1  ;;  %5403 = vmatprep.subr.mxu1 %v5676_v1 }
  0x25   : > { %5391 = vmatmul.mubr.msk.f32.vlgmr.msra.gmra.mrb[10].mxu0 %vm204_vm1, %v181_v12  ;;  %5396 = vmatmul.mubr.msk.f32.vlgmr.msra.gmra.mrb[10].mxu1 %vm204_vm1, %v182_v13 }
  0x26   : > { %5399 = vmatpush3.msra.mxu0 %v5709_v0  ;;  %5400 = vmatprep.mubr.msk.f32.mxu0 %vm5677_vm0, %v5676_v1 }
  0x27   : > { %5404 = vmatpush3.msra.mxu1 %v5709_v0  ;;  %5405 = vmatprep.mubr.msk.f32.mxu1 %vm5677_vm0, %v5676_v1 }
  0x28   : > { %5408 = vmatprep.subr.mxu0 %v5676_v1  ;;  %5413 = vmatprep.subr.mxu1 %v5676_v1 }
  0x29   : > { %5401 = vmatmul.mubr.msk.f32.vlgmr.msra.gmra.mrb[12].mxu0 %vm204_vm1, %v183_v14  ;;  %5406 = vmatmul.mubr.msk.f32.vlgmr.msra.gmra.mrb[12].mxu1 %vm204_vm1, %v184_v15 }
  0x2a   : > { %5409 = vmatpush3.msra.mxu0 %v5709_v0  ;;  %5410 = vmatprep.mubr.msk.f32.mxu0 %vm5677_vm0, %v5676_v1 }
  0x2b   : > { %5414 = vmatpush3.msra.mxu1 %v5709_v0  ;;  %5415 = vmatprep.mubr.msk.f32.mxu1 %vm5677_vm0, %v5676_v1 }
  0x2c   : > { %5418 = vmatprep.subr.mxu0 %v5676_v1  ;;  %5423 = vmatprep.subr.mxu1 %v5676_v1 }
  0x2d   : > { %5411 = vmatmul.mubr.msk.f32.vlgmr.msra.gmra.mrb[14].mxu0 %vm204_vm1, %v185_v16  ;;  %5416 = vmatmul.mubr.msk.f32.vlgmr.msra.gmra.mrb[14].mxu1 %vm204_vm1, %v186_v17 }
  0x2e   : > { %5419 = vmatpush3.msra.mxu0 %v5709_v0  ;;  %5420 = vmatprep.mubr.msk.f32.mxu0 %vm5677_vm0, %v5676_v1 }
  0x2f   : > { %5424 = vmatpush3.msra.mxu1 %v5709_v0  ;;  %5425 = vmatprep.mubr.msk.f32.mxu1 %vm5677_vm0, %v5676_v1 }
  0x30   : > { %5428 = vmatprep.subr.mxu0 %v5676_v1  ;;  %5433 = vmatprep.subr.mxu1 %v5676_v1 }
  0x31   : > { %5421 = vmatmul.mubr.msk.f32.vlgmr.msra.gmra.mrb[16].mxu0 %vm204_vm1, %v187_v18  ;;  %5426 = vmatmul.mubr.msk.f32.vlgmr.msra.gmra.mrb[16].mxu1 %vm204_vm1, %v188_v19 }
  0x32   : > { %5429 = vmatpush3.msra.mxu0 %v5709_v0  ;;  %5430 = vmatprep.mubr.msk.f32.mxu0 %vm5677_vm0, %v5676_v1 }
  0x33   : > { %5434 = vmatpush3.msra.mxu1 %v5709_v0  ;;  %5435 = vmatprep.mubr.msk.f32.mxu1 %vm5677_vm0, %v5676_v1 }
  0x34   : > { %5438 = vmatprep.subr.mxu0 %v5676_v1  ;;  %5443 = vmatprep.subr.mxu1 %v5676_v1 }
  0x35   : > { %5431 = vmatmul.mubr.msk.f32.vlgmr.msra.gmra.mrb[18].mxu0 %vm204_vm1, %v189_v20  ;;  %5436 = vmatmul.mubr.msk.f32.vlgmr.msra.gmra.mrb[18].mxu1 %vm204_vm1, %v190_v21 }
  0x36   : > { %5439 = vmatpush3.msra.mxu0 %v5709_v0  ;;  %5440 = vmatprep.mubr.msk.f32.mxu0 %vm5677_vm0, %v5676_v1 }
  0x37   : > { %5444 = vmatpush3.msra.mxu1 %v5709_v0  ;;  %5445 = vmatprep.mubr.msk.f32.mxu1 %vm5677_vm0, %v5676_v1 }
  0x38   : > { %5448 = vmatprep.subr.mxu0 %v5676_v1  ;;  %5453 = vmatprep.subr.mxu1 %v5676_v1 }
  0x39   : > { %5441 = vmatmul.mubr.msk.f32.vlgmr.msra.gmra.mrb[20].mxu0 %vm204_vm1, %v191_v22  ;;  %5446 = vmatmul.mubr.msk.f32.vlgmr.msra.gmra.mrb[20].mxu1 %vm204_vm1, %v192_v23 }
  0x3a   : > { %5449 = vmatpush3.msra.mxu0 %v5709_v0  ;;  %5450 = vmatprep.mubr.msk.f32.mxu0 %vm5677_vm0, %v5676_v1 }
  0x3b   : > { %5454 = vmatpush3.msra.mxu1 %v5709_v0  ;;  %5455 = vmatprep.mubr.msk.f32.mxu1 %vm5677_vm0, %v5676_v1 }
  0x3c   : > { %5458 = vmatprep.subr.mxu0 %v5676_v1  ;;  %5463 = vmatprep.subr.mxu1 %v5676_v1 }
  0x3d   : > { %5451 = vmatmul.mubr.msk.f32.vlgmr.msra.gmra.mrb[22].mxu0 %vm204_vm1, %v193_v24  ;;  %5456 = vmatmul.mubr.msk.f32.vlgmr.msra.gmra.mrb[22].mxu1 %vm204_vm1, %v194_v25 }
  0x3e   : > { %5459 = vmatpush3.msra.mxu0 %v5709_v0  ;;  %5460 = vmatprep.mubr.msk.f32.mxu0 %vm5677_vm0, %v5676_v1 }
  0x3f   : > { %5464 = vmatpush3.msra.mxu1 %v5709_v0  ;;  %5465 = vmatprep.mubr.msk.f32.mxu1 %vm5677_vm0, %v5676_v1 }
  0x40   : > { %5468 = vmatprep.subr.mxu0 %v5676_v1  ;;  %5473 = vmatprep.subr.mxu1 %v5676_v1 }
  0x41   : > { %5461 = vmatmul.mubr.msk.f32.vlgmr.msra.gmra.mrb[24].mxu0 %vm204_vm1, %v195_v26  ;;  %5466 = vmatmul.mubr.msk.f32.vlgmr.msra.gmra.mrb[24].mxu1 %vm204_vm1, %v196_v27 }
  0x42   : > { %5469 = vmatpush3.msra.mxu0 %v5709_v0  ;;  %5470 = vmatprep.mubr.msk.f32.mxu0 %vm5677_vm0, %v5676_v1 }
  0x43   : > { %5474 = vmatpush3.msra.mxu1 %v5709_v0  ;;  %5475 = vmatprep.mubr.msk.f32.mxu1 %vm5677_vm0, %v5676_v1 }
  0x44   : > { %5478 = vmatprep.subr.mxu0 %v5676_v1  ;;  %5483 = vmatprep.subr.mxu1 %v5676_v1 }
  0x45   : > { %5471 = vmatmul.mubr.msk.f32.vlgmr.msra.gmra.mrb[26].mxu0 %vm204_vm1, %v197_v28  ;;  %5476 = vmatmul.mubr.msk.f32.vlgmr.msra.gmra.mrb[26].mxu1 %vm204_vm1, %v198_v29 }
  0x46   : > { %5479 = vmatpush3.msra.mxu0 %v5709_v0  ;;  %5480 = vmatprep.mubr.msk.f32.mxu0 %vm5677_vm0, %v5676_v1 }
  0x47   : > { %5484 = vmatpush3.msra.mxu1 %v5709_v0  ;;  %5485 = vmatprep.mubr.msk.f32.mxu1 %vm5677_vm0, %v5676_v1 }
  0x48   : > { %5488 = vmatprep.subr.mxu0 %v5676_v1  ;;  %5493 = vmatprep.subr.mxu1 %v5676_v1 }
  0x49   : > { %5481 = vmatmul.mubr.msk.f32.vlgmr.msra.gmra.mrb[28].mxu0 %vm204_vm1, %v199_v30  ;;  %5486 = vmatmul.mubr.msk.f32.vlgmr.msra.gmra.mrb[28].mxu1 %vm204_vm1, %v200_v31 }
  0x4a   : > { %5489 = vmatpush3.msra.mxu0 %v5709_v0  ;;  %5490 = vmatprep.mubr.msk.f32.mxu0 %vm5677_vm0, %v5676_v1 }
  0x4b   : > { %5494 = vmatpush3.msra.mxu1 %v5709_v0  ;;  %5495 = vmatprep.mubr.msk.f32.mxu1 %vm5677_vm0, %v5676_v1 }
  0x4d   : > { %5491 = vmatmul.mubr.msk.f32.vlgmr.msra.gmra.mrb[30].mxu0 %vm204_vm1, %v201_v32  ;;  %5496 = vmatmul.mubr.msk.f32.vlgmr.msra.gmra.mrb[30].mxu1 %vm204_vm1, %v202_v33 }
  0x4e   : > { %5500 = vmatprep.mubr.msk.f32.mxu0 %vm204_vm1, %v5914_v34  ;;  %5505 = vmatprep.mubr.msk.f32.mxu1 %vm204_vm1, %v5914_v34 }
  0xe4   : > { %v274_v35 = vpop.f32.mrb[0].mxu0  ;;  %v347_v36 = vpop.f32.mrb[0].mxu1 }
  0xe5   : > { %v5342_v38 = vpop.f32.mrb[1].mxu0  ;;  %v5347_v39 = vpop.f32.mrb[1].mxu1  ;;  %5498 = vmatprep.subr.mxu0 %v274_v35  ;;  %5503 = vmatprep.subr.mxu1 %v347_v36 }
  0xe6   : > { %5499 = vmatpush3.msra.mxu0 %v274_v35  ;;  %5504 = vmatpush3.msra.mxu1 %v347_v36 }
  0xe7   : > { %5501 = vmatmul.mubr.msk.f32.vlgmr.msra.gmra.mrb[32].mxu0 %vm204_vm1, %v5923_v37  ;;  %5506 = vmatmul.mubr.msk.f32.vlgmr.msra.gmra.mrb[32].mxu1 %vm204_vm1, %v5923_v37 }
  0xe8   : > { %v420_v40 = vpop.f32.mrb[2].mxu0  ;;  %v493_v41 = vpop.f32.mrb[2].mxu1  ;;  %5510 = vmatprep.mubr.msk.f32.mxu0 %vm204_vm1, %v5914_v34  ;;  %5515 = vmatprep.mubr.msk.f32.mxu1 %vm204_vm1, %v5914_v34 }
  0xe9   : > { %v5352_v42 = vpop.f32.mrb[3].mxu0  ;;  %v5357_v43 = vpop.f32.mrb[3].mxu1  ;;  %5508 = vmatprep.subr.mxu0 %v420_v40  ;;  %5513 = vmatprep.subr.mxu1 %v493_v41 }
  0xea   : > { %5509 = vmatpush3.msra.mxu0 %v420_v40  ;;  %5514 = vmatpush3.msra.mxu1 %v493_v41 }
  0xeb   : > { %5511 = vmatmul.mubr.msk.f32.vlgmr.msra.gmra.mrb[34].mxu0 %vm204_vm1, %v5923_v37  ;;  %5516 = vmatmul.mubr.msk.f32.vlgmr.msra.gmra.mrb[34].mxu1 %vm204_vm1, %v5923_v37 }
  0xec   : > { %v566_v44 = vpop.f32.mrb[4].mxu0  ;;  %v639_v45 = vpop.f32.mrb[4].mxu1  ;;  %5520 = vmatprep.mubr.msk.f32.mxu0 %vm204_vm1, %v5914_v34  ;;  %5525 = vmatprep.mubr.msk.f32.mxu1 %vm204_vm1, %v5914_v34 }
  0xed   : > { %v5362_v46 = vpop.f32.mrb[5].mxu0  ;;  %v5367_v47 = vpop.f32.mrb[5].mxu1  ;;  %5518 = vmatprep.subr.mxu0 %v566_v44  ;;  %5523 = vmatprep.subr.mxu1 %v639_v45 }
  0xee   : > { %5519 = vmatpush3.msra.mxu0 %v566_v44  ;;  %5524 = vmatpush3.msra.mxu1 %v639_v45 }
  0xef   : > { %5521 = vmatmul.mubr.msk.f32.vlgmr.msra.gmra.mrb[36].mxu0 %vm204_vm1, %v5923_v37  ;;  %5526 = vmatmul.mubr.msk.f32.vlgmr.msra.gmra.mrb[36].mxu1 %vm204_vm1, %v5923_v37 }
  0xf0   : > { %v712_v48 = vpop.f32.mrb[6].mxu0  ;;  %v785_v49 = vpop.f32.mrb[6].mxu1  ;;  %5530 = vmatprep.mubr.msk.f32.mxu0 %vm204_vm1, %v5914_v34  ;;  %5535 = vmatprep.mubr.msk.f32.mxu1 %vm204_vm1, %v5914_v34 }
  0xf1   : > { %v5372_v50 = vpop.f32.mrb[7].mxu0  ;;  %v5377_v51 = vpop.f32.mrb[7].mxu1  ;;  %5528 = vmatprep.subr.mxu0 %v712_v48  ;;  %5533 = vmatprep.subr.mxu1 %v785_v49 }
  0xf2   : > { %5529 = vmatpush3.msra.mxu0 %v712_v48  ;;  %5534 = vmatpush3.msra.mxu1 %v785_v49 }
  0xf3   : > { %5531 = vmatmul.mubr.msk.f32.vlgmr.msra.gmra.mrb[38].mxu0 %vm204_vm1, %v5923_v37  ;;  %5536 = vmatmul.mubr.msk.f32.vlgmr.msra.gmra.mrb[38].mxu1 %vm204_vm1, %v5923_v37 }
  0xf4   : > { %v858_v52 = vpop.f32.mrb[8].mxu0  ;;  %v931_v53 = vpop.f32.mrb[8].mxu1  ;;  %5540 = vmatprep.mubr.msk.f32.mxu0 %vm204_vm1, %v5914_v34  ;;  %5545 = vmatprep.mubr.msk.f32.mxu1 %vm204_vm1, %v5914_v34 }
  0xf5   : > { %v5382_v54 = vpop.f32.mrb[9].mxu0  ;;  %v5387_v55 = vpop.f32.mrb[9].mxu1  ;;  %5538 = vmatprep.subr.mxu0 %v858_v52  ;;  %5543 = vmatprep.subr.mxu1 %v931_v53 }
  0xf6   : > { %5539 = vmatpush3.msra.mxu0 %v858_v52  ;;  %5544 = vmatpush3.msra.mxu1 %v931_v53 }
  0xf7   : > { %5541 = vmatmul.mubr.msk.f32.vlgmr.msra.gmra.mrb[40].mxu0 %vm204_vm1, %v5923_v37  ;;  %5546 = vmatmul.mubr.msk.f32.vlgmr.msra.gmra.mrb[40].mxu1 %vm204_vm1, %v5923_v37 }
  0xf8   : > { %v1004_v56 = vpop.f32.mrb[10].mxu0  ;;  %v1077_v57 = vpop.f32.mrb[10].mxu1  ;;  %5550 = vmatprep.mubr.msk.f32.mxu0 %vm204_vm1, %v5914_v34  ;;  %5555 = vmatprep.mubr.msk.f32.mxu1 %vm204_vm1, %v5914_v34 }
  0xf9   : > { %v5392_v58 = vpop.f32.mrb[11].mxu0  ;;  %v5397_v59 = vpop.f32.mrb[11].mxu1  ;;  %5548 = vmatprep.subr.mxu0 %v1004_v56  ;;  %5553 = vmatprep.subr.mxu1 %v1077_v57 }
  0xfa   : > { %5549 = vmatpush3.msra.mxu0 %v1004_v56  ;;  %5554 = vmatpush3.msra.mxu1 %v1077_v57 }
  0xfb   : > { %5551 = vmatmul.mubr.msk.f32.vlgmr.msra.gmra.mrb[42].mxu0 %vm204_vm1, %v5923_v37  ;;  %5556 = vmatmul.mubr.msk.f32.vlgmr.msra.gmra.mrb[42].mxu1 %vm204_vm1, %v5923_v37 }
  0xfc   : > { %v1150_v60 = vpop.f32.mrb[12].mxu0  ;;  %v1223_v61 = vpop.f32.mrb[12].mxu1  ;;  %5560 = vmatprep.mubr.msk.f32.mxu0 %vm204_vm1, %v5914_v34  ;;  %5565 = vmatprep.mubr.msk.f32.mxu1 %vm204_vm1, %v5914_v34 }
  0xfd   : > { %v5402_v62 = vpop.f32.mrb[13].mxu0  ;;  %v5407_v63 = vpop.f32.mrb[13].mxu1  ;;  %5558 = vmatprep.subr.mxu0 %v1150_v60  ;;  %5563 = vmatprep.subr.mxu1 %v1223_v61 }
  0xfe   : > { %5559 = vmatpush3.msra.mxu0 %v1150_v60  ;;  %5564 = vmatpush3.msra.mxu1 %v1223_v61 }
  0xff   : > { %5561 = vmatmul.mubr.msk.f32.vlgmr.msra.gmra.mrb[44].mxu0 %vm204_vm1, %v5923_v37  ;;  %5566 = vmatmul.mubr.msk.f32.vlgmr.msra.gmra.mrb[44].mxu1 %vm204_vm1, %v5923_v37 }
 0x100   : > { %v1296_v0 = vpop.f32.mrb[14].mxu0  ;;  %v1369_v1 = vpop.f32.mrb[14].mxu1  ;;  %5570 = vmatprep.mubr.msk.f32.mxu0 %vm204_vm1, %v5914_v34  ;;  %5575 = vmatprep.mubr.msk.f32.mxu1 %vm204_vm1, %v5914_v34 }
 0x101   : > { %v5412_v2 = vpop.f32.mrb[15].mxu0  ;;  %v5417_v3 = vpop.f32.mrb[15].mxu1  ;;  %5568 = vmatprep.subr.mxu0 %v1296_v0  ;;  %5573 = vmatprep.subr.mxu1 %v1369_v1 }
 0x102   : > { %5569 = vmatpush3.msra.mxu0 %v1296_v0  ;;  %5574 = vmatpush3.msra.mxu1 %v1369_v1 }
 0x103   : > { %5571 = vmatmul.mubr.msk.f32.vlgmr.msra.gmra.mrb[46].mxu0 %vm204_vm1, %v5923_v37  ;;  %5576 = vmatmul.mubr.msk.f32.vlgmr.msra.gmra.mrb[46].mxu1 %vm204_vm1, %v5923_v37 }
 0x104   : > { %v1442_v4 = vpop.f32.mrb[16].mxu0  ;;  %v1515_v5 = vpop.f32.mrb[16].mxu1  ;;  %5580 = vmatprep.mubr.msk.f32.mxu0 %vm204_vm1, %v5914_v34  ;;  %5585 = vmatprep.mubr.msk.f32.mxu1 %vm204_vm1, %v5914_v34 }
 0x105   : > { %v5422_v6 = vpop.f32.mrb[17].mxu0  ;;  %v5427_v7 = vpop.f32.mrb[17].mxu1  ;;  %5578 = vmatprep.subr.mxu0 %v1442_v4  ;;  %5583 = vmatprep.subr.mxu1 %v1515_v5 }
 0x106   : > { %5579 = vmatpush3.msra.mxu0 %v1442_v4  ;;  %5584 = vmatpush3.msra.mxu1 %v1515_v5 }
 0x107   : > { %5581 = vmatmul.mubr.msk.f32.vlgmr.msra.gmra.mrb[48].mxu0 %vm204_vm1, %v5923_v37  ;;  %5586 = vmatmul.mubr.msk.f32.vlgmr.msra.gmra.mrb[48].mxu1 %vm204_vm1, %v5923_v37 }
 0x108   : > { %v1588_v8 = vpop.f32.mrb[18].mxu0  ;;  %v1661_v9 = vpop.f32.mrb[18].mxu1  ;;  %5590 = vmatprep.mubr.msk.f32.mxu0 %vm204_vm1, %v5914_v34  ;;  %5595 = vmatprep.mubr.msk.f32.mxu1 %vm204_vm1, %v5914_v34 }
 0x109   : > { %v5432_v10 = vpop.f32.mrb[19].mxu0  ;;  %v5437_v11 = vpop.f32.mrb[19].mxu1  ;;  %5588 = vmatprep.subr.mxu0 %v1588_v8  ;;  %5593 = vmatprep.subr.mxu1 %v1661_v9 }
 0x10a   : > { %5589 = vmatpush3.msra.mxu0 %v1588_v8  ;;  %5594 = vmatpush3.msra.mxu1 %v1661_v9 }
 0x10b   : > { %5591 = vmatmul.mubr.msk.f32.vlgmr.msra.gmra.mrb[50].mxu0 %vm204_vm1, %v5923_v37  ;;  %5596 = vmatmul.mubr.msk.f32.vlgmr.msra.gmra.mrb[50].mxu1 %vm204_vm1, %v5923_v37 }
 0x10c   : > { %v1734_v12 = vpop.f32.mrb[20].mxu0  ;;  %v1807_v13 = vpop.f32.mrb[20].mxu1  ;;  %5600 = vmatprep.mubr.msk.f32.mxu0 %vm204_vm1, %v5914_v34  ;;  %5605 = vmatprep.mubr.msk.f32.mxu1 %vm204_vm1, %v5914_v34 }
 0x10d   : > { %v5442_v14 = vpop.f32.mrb[21].mxu0  ;;  %v5447_v15 = vpop.f32.mrb[21].mxu1  ;;  %5598 = vmatprep.subr.mxu0 %v1734_v12  ;;  %5603 = vmatprep.subr.mxu1 %v1807_v13 }
 0x10e   : > { %5599 = vmatpush3.msra.mxu0 %v1734_v12  ;;  %5604 = vmatpush3.msra.mxu1 %v1807_v13 }
 0x10f   : > { %5601 = vmatmul.mubr.msk.f32.vlgmr.msra.gmra.mrb[52].mxu0 %vm204_vm1, %v5923_v37  ;;  %5606 = vmatmul.mubr.msk.f32.vlgmr.msra.gmra.mrb[52].mxu1 %vm204_vm1, %v5923_v37 }
 0x110   : > { %v1880_v16 = vpop.f32.mrb[22].mxu0  ;;  %v1953_v17 = vpop.f32.mrb[22].mxu1  ;;  %5610 = vmatprep.mubr.msk.f32.mxu0 %vm204_vm1, %v5914_v34  ;;  %5615 = vmatprep.mubr.msk.f32.mxu1 %vm204_vm1, %v5914_v34 }
 0x111   : > { %v5452_v18 = vpop.f32.mrb[23].mxu0  ;;  %v5457_v19 = vpop.f32.mrb[23].mxu1  ;;  %5608 = vmatprep.subr.mxu0 %v1880_v16  ;;  %5613 = vmatprep.subr.mxu1 %v1953_v17 }
 0x112   : > { %5609 = vmatpush3.msra.mxu0 %v1880_v16  ;;  %5614 = vmatpush3.msra.mxu1 %v1953_v17 }
 0x113   : > { %5611 = vmatmul.mubr.msk.f32.vlgmr.msra.gmra.mrb[54].mxu0 %vm204_vm1, %v5923_v37  ;;  %5616 = vmatmul.mubr.msk.f32.vlgmr.msra.gmra.mrb[54].mxu1 %vm204_vm1, %v5923_v37 }
 0x114   : > { %v2026_v20 = vpop.f32.mrb[24].mxu0  ;;  %v2099_v21 = vpop.f32.mrb[24].mxu1  ;;  %5620 = vmatprep.mubr.msk.f32.mxu0 %vm204_vm1, %v5914_v34  ;;  %5625 = vmatprep.mubr.msk.f32.mxu1 %vm204_vm1, %v5914_v34 }
 0x115   : > { %v5462_v22 = vpop.f32.mrb[25].mxu0  ;;  %v5467_v23 = vpop.f32.mrb[25].mxu1  ;;  %5618 = vmatprep.subr.mxu0 %v2026_v20  ;;  %5623 = vmatprep.subr.mxu1 %v2099_v21 }
 0x116   : > { %5619 = vmatpush3.msra.mxu0 %v2026_v20  ;;  %5624 = vmatpush3.msra.mxu1 %v2099_v21 }
 0x117   : > { %5621 = vmatmul.mubr.msk.f32.vlgmr.msra.gmra.mrb[56].mxu0 %vm204_vm1, %v5923_v37  ;;  %5626 = vmatmul.mubr.msk.f32.vlgmr.msra.gmra.mrb[56].mxu1 %vm204_vm1, %v5923_v37 }
 0x118   : > { %v2172_v24 = vpop.f32.mrb[26].mxu0  ;;  %v2245_v25 = vpop.f32.mrb[26].mxu1  ;;  %5630 = vmatprep.mubr.msk.f32.mxu0 %vm204_vm1, %v5914_v34  ;;  %5635 = vmatprep.mubr.msk.f32.mxu1 %vm204_vm1, %v5914_v34 }
 0x119   : > { %v5472_v26 = vpop.f32.mrb[27].mxu0  ;;  %v5477_v27 = vpop.f32.mrb[27].mxu1  ;;  %5628 = vmatprep.subr.mxu0 %v2172_v24  ;;  %5633 = vmatprep.subr.mxu1 %v2245_v25 }
 0x11a   : > { %5629 = vmatpush3.msra.mxu0 %v2172_v24  ;;  %5634 = vmatpush3.msra.mxu1 %v2245_v25 }
 0x11b   : > { %5631 = vmatmul.mubr.msk.f32.vlgmr.msra.gmra.mrb[58].mxu0 %vm204_vm1, %v5923_v37  ;;  %5636 = vmatmul.mubr.msk.f32.vlgmr.msra.gmra.mrb[58].mxu1 %vm204_vm1, %v5923_v37 }
 0x11c   : > { %v2318_v28 = vpop.f32.mrb[28].mxu0  ;;  %v2391_v29 = vpop.f32.mrb[28].mxu1  ;;  %5640 = vmatprep.mubr.msk.f32.mxu0 %vm204_vm1, %v5914_v34  ;;  %5645 = vmatprep.mubr.msk.f32.mxu1 %vm204_vm1, %v5914_v34 }
 0x11d   : > { %v5482_v30 = vpop.f32.mrb[29].mxu0  ;;  %v5487_v31 = vpop.f32.mrb[29].mxu1  ;;  %5638 = vmatprep.subr.mxu0 %v2318_v28  ;;  %5643 = vmatprep.subr.mxu1 %v2391_v29 }
 0x11e   : > { %5639 = vmatpush3.msra.mxu0 %v2318_v28  ;;  %5644 = vmatpush3.msra.mxu1 %v2391_v29 }
 0x11f   : > { %5641 = vmatmul.mubr.msk.f32.vlgmr.msra.gmra.mrb[60].mxu0 %vm204_vm1, %v5923_v37  ;;  %5646 = vmatmul.mubr.msk.f32.vlgmr.msra.gmra.mrb[60].mxu1 %vm204_vm1, %v5923_v37 }
 0x120   : > { %v2464_v32 = vpop.f32.mrb[30].mxu0  ;;  %v2537_v33 = vpop.f32.mrb[30].mxu1  ;;  %5650 = vmatprep.mubr.msk.f32.mxu0 %vm204_vm1, %v5914_v34  ;;  %5655 = vmatprep.mubr.msk.f32.mxu1 %vm204_vm1, %v5914_v34 }
 0x121   : > { %v5492_v35 = vpop.f32.mrb[31].mxu0  ;;  %v5497_v36 = vpop.f32.mrb[31].mxu1  ;;  %5648 = vmatprep.subr.mxu0 %v2464_v32  ;;  %5653 = vmatprep.subr.mxu1 %v2537_v33 }
 0x122   : > { %5649 = vmatpush3.msra.mxu0 %v2464_v32  ;;  %5654 = vmatpush3.msra.mxu1 %v2537_v33 }
 0x123   : > { %5651 = vmatmul.mubr.msk.f32.vlgmr.msra.gmra.mrb[62].mxu0 %vm204_vm1, %v5923_v37  ;;  %5656 = vmatmul.mubr.msk.f32.vlgmr.msra.gmra.mrb[62].mxu1 %vm204_vm1, %v5923_v37 }
 0x1ba   : > { %v5502_v34 = vpop.f32.mrb[32].mxu0  ;;  %v5507_v38 = vpop.f32.mrb[32].mxu1 }
 0x1bb   : > { %4951 = vst.msk [vmem:[%s6053_s27 + $0x8] sm:$0xff] %vm4949_vm2, %v5502_v34  ;;  %4953 = vst.msk [vmem:[%s6053_s27 + $0x18] sm:$0xff] %vm4949_vm2, %v5507_v38  ;;  %v2615_v37 = vpop.f32.mrb[33].mxu0  ;;  %v2690_v39 = vpop.f32.mrb[33].mxu1 }
 0x1bc   : > { %4950 = vst.msk [vmem:[%s6053_s27] sm:$0xff] %vm4949_vm2, %v2615_v37  ;;  %4952 = vst.msk [vmem:[%s6053_s27 + $0x10] sm:$0xff] %vm4949_vm2, %v2690_v39 }
 0x1be   : > { %v5512_v40 = vpop.f32.mrb[34].mxu0  ;;  %v5517_v41 = vpop.f32.mrb[34].mxu1 }
 0x1bf   : > { %4955 = vst.msk [vmem:[%s6053_s27 + $0x28] sm:$0xff] %vm4949_vm2, %v5512_v40  ;;  %4957 = vst.msk [vmem:[%s6053_s27 + $0x38] sm:$0xff] %vm4949_vm2, %v5517_v41  ;;  %v2765_v42 = vpop.f32.mrb[35].mxu0  ;;  %v2840_v43 = vpop.f32.mrb[35].mxu1 }
 0x1c0   : > { %4954 = vst.msk [vmem:[%s6053_s27 + $0x20] sm:$0xff] %vm4949_vm2, %v2765_v42  ;;  %4956 = vst.msk [vmem:[%s6053_s27 + $0x30] sm:$0xff] %vm4949_vm2, %v2840_v43 }
 0x1c2   : > { %v5522_v44 = vpop.f32.mrb[36].mxu0  ;;  %v5527_v45 = vpop.f32.mrb[36].mxu1 }
 0x1c3   : > { %4959 = vst.msk [vmem:[%s6053_s27 + $0x48] sm:$0xff] %vm4949_vm2, %v5522_v44  ;;  %4961 = vst.msk [vmem:[%s6053_s27 + $0x58] sm:$0xff] %vm4949_vm2, %v5527_v45  ;;  %v2915_v46 = vpop.f32.mrb[37].mxu0  ;;  %v2990_v47 = vpop.f32.mrb[37].mxu1 }
 0x1c4   : > { %4958 = vst.msk [vmem:[%s6053_s27 + $0x40] sm:$0xff] %vm4949_vm2, %v2915_v46  ;;  %4960 = vst.msk [vmem:[%s6053_s27 + $0x50] sm:$0xff] %vm4949_vm2, %v2990_v47 }
 0x1c6   : > { %v5532_v48 = vpop.f32.mrb[38].mxu0  ;;  %v5537_v49 = vpop.f32.mrb[38].mxu1 }
 0x1c7   : > { %4963 = vst.msk [vmem:[%s6053_s27 + $0x68] sm:$0xff] %vm4949_vm2, %v5532_v48  ;;  %4965 = vst.msk [vmem:[%s6053_s27 + $0x78] sm:$0xff] %vm4949_vm2, %v5537_v49  ;;  %v3065_v50 = vpop.f32.mrb[39].mxu0  ;;  %v3140_v51 = vpop.f32.mrb[39].mxu1 }
 0x1c8   : > { %4962 = vst.msk [vmem:[%s6053_s27 + $0x60] sm:$0xff] %vm4949_vm2, %v3065_v50  ;;  %4964 = vst.msk [vmem:[%s6053_s27 + $0x70] sm:$0xff] %vm4949_vm2, %v3140_v51 }
 0x1ca   : > { %v5542_v52 = vpop.f32.mrb[40].mxu0  ;;  %v5547_v53 = vpop.f32.mrb[40].mxu1 }
 0x1cb   : > { %4967 = vst.msk [vmem:[%s6053_s27 + $0x88] sm:$0xff] %vm4949_vm2, %v5542_v52  ;;  %4969 = vst.msk [vmem:[%s6053_s27 + $0x98] sm:$0xff] %vm4949_vm2, %v5547_v53  ;;  %v3215_v54 = vpop.f32.mrb[41].mxu0  ;;  %v3290_v55 = vpop.f32.mrb[41].mxu1 }
 0x1cc   : > { %4966 = vst.msk [vmem:[%s6053_s27 + $0x80] sm:$0xff] %vm4949_vm2, %v3215_v54  ;;  %4968 = vst.msk [vmem:[%s6053_s27 + $0x90] sm:$0xff] %vm4949_vm2, %v3290_v55 }
 0x1ce   : > { %v5552_v56 = vpop.f32.mrb[42].mxu0  ;;  %v5557_v57 = vpop.f32.mrb[42].mxu1 }
 0x1cf   : > { %4971 = vst.msk [vmem:[%s6053_s27 + $0xa8] sm:$0xff] %vm4949_vm2, %v5552_v56  ;;  %4973 = vst.msk [vmem:[%s6053_s27 + $0xb8] sm:$0xff] %vm4949_vm2, %v5557_v57  ;;  %v3365_v58 = vpop.f32.mrb[43].mxu0  ;;  %v3440_v59 = vpop.f32.mrb[43].mxu1 }
 0x1d0   : > { %4970 = vst.msk [vmem:[%s6053_s27 + $0xa0] sm:$0xff] %vm4949_vm2, %v3365_v58  ;;  %4972 = vst.msk [vmem:[%s6053_s27 + $0xb0] sm:$0xff] %vm4949_vm2, %v3440_v59 }
 0x1d2   : > { %v5562_v60 = vpop.f32.mrb[44].mxu0  ;;  %v5567_v61 = vpop.f32.mrb[44].mxu1 }
 0x1d3   : > { %4975 = vst.msk [vmem:[%s6053_s27 + $0xc8] sm:$0xff] %vm4949_vm2, %v5562_v60  ;;  %4977 = vst.msk [vmem:[%s6053_s27 + $0xd8] sm:$0xff] %vm4949_vm2, %v5567_v61  ;;  %v3515_v62 = vpop.f32.mrb[45].mxu0  ;;  %v3590_v63 = vpop.f32.mrb[45].mxu1 }
 0x1d4   : > { %4974 = vst.msk [vmem:[%s6053_s27 + $0xc0] sm:$0xff] %vm4949_vm2, %v3515_v62  ;;  %4976 = vst.msk [vmem:[%s6053_s27 + $0xd0] sm:$0xff] %vm4949_vm2, %v3590_v63 }
 0x1d6   : > { %v5572_v0 = vpop.f32.mrb[46].mxu0  ;;  %v5577_v1 = vpop.f32.mrb[46].mxu1 }
 0x1d7   : > { %4979 = vst.msk [vmem:[%s6053_s27 + $0xe8] sm:$0xff] %vm4949_vm2, %v5572_v0  ;;  %4981 = vst.msk [vmem:[%s6053_s27 + $0xf8] sm:$0xff] %vm4949_vm2, %v5577_v1  ;;  %v3665_v2 = vpop.f32.mrb[47].mxu0  ;;  %v3740_v3 = vpop.f32.mrb[47].mxu1 }
 0x1d8   : > { %4978 = vst.msk [vmem:[%s6053_s27 + $0xe0] sm:$0xff] %vm4949_vm2, %v3665_v2  ;;  %4980 = vst.msk [vmem:[%s6053_s27 + $0xf0] sm:$0xff] %vm4949_vm2, %v3740_v3 }
 0x1da   : > { %v5582_v4 = vpop.f32.mrb[48].mxu0  ;;  %v5587_v5 = vpop.f32.mrb[48].mxu1 }
 0x1db   : > { %4983 = vst.msk [vmem:[%s6053_s27 + $0x108] sm:$0xff] %vm4949_vm2, %v5582_v4  ;;  %4985 = vst.msk [vmem:[%s6053_s27 + $0x118] sm:$0xff] %vm4949_vm2, %v5587_v5  ;;  %v3815_v6 = vpop.f32.mrb[49].mxu0  ;;  %v3890_v7 = vpop.f32.mrb[49].mxu1 }
 0x1dc   : > { %4982 = vst.msk [vmem:[%s6053_s27 + $0x100] sm:$0xff] %vm4949_vm2, %v3815_v6  ;;  %4984 = vst.msk [vmem:[%s6053_s27 + $0x110] sm:$0xff] %vm4949_vm2, %v3890_v7 }
 0x1de   : > { %v5592_v8 = vpop.f32.mrb[50].mxu0  ;;  %v5597_v9 = vpop.f32.mrb[50].mxu1 }
 0x1df   : > { %4987 = vst.msk [vmem:[%s6053_s27 + $0x128] sm:$0xff] %vm4949_vm2, %v5592_v8  ;;  %4989 = vst.msk [vmem:[%s6053_s27 + $0x138] sm:$0xff] %vm4949_vm2, %v5597_v9  ;;  %v3965_v10 = vpop.f32.mrb[51].mxu0  ;;  %v4040_v11 = vpop.f32.mrb[51].mxu1 }
 0x1e0   : > { %4986 = vst.msk [vmem:[%s6053_s27 + $0x120] sm:$0xff] %vm4949_vm2, %v3965_v10  ;;  %4988 = vst.msk [vmem:[%s6053_s27 + $0x130] sm:$0xff] %vm4949_vm2, %v4040_v11 }
 0x1e2   : > { %v5602_v12 = vpop.f32.mrb[52].mxu0  ;;  %v5607_v13 = vpop.f32.mrb[52].mxu1 }
 0x1e3   : > { %4991 = vst.msk [vmem:[%s6053_s27 + $0x148] sm:$0xff] %vm4949_vm2, %v5602_v12  ;;  %4993 = vst.msk [vmem:[%s6053_s27 + $0x158] sm:$0xff] %vm4949_vm2, %v5607_v13  ;;  %v4115_v14 = vpop.f32.mrb[53].mxu0  ;;  %v4190_v15 = vpop.f32.mrb[53].mxu1 }
 0x1e4   : > { %4990 = vst.msk [vmem:[%s6053_s27 + $0x140] sm:$0xff] %vm4949_vm2, %v4115_v14  ;;  %4992 = vst.msk [vmem:[%s6053_s27 + $0x150] sm:$0xff] %vm4949_vm2, %v4190_v15 }
 0x1e6   : > { %v5612_v16 = vpop.f32.mrb[54].mxu0  ;;  %v5617_v17 = vpop.f32.mrb[54].mxu1 }
 0x1e7   : > { %4995 = vst.msk [vmem:[%s6053_s27 + $0x168] sm:$0xff] %vm4949_vm2, %v5612_v16  ;;  %4997 = vst.msk [vmem:[%s6053_s27 + $0x178] sm:$0xff] %vm4949_vm2, %v5617_v17  ;;  %v4265_v18 = vpop.f32.mrb[55].mxu0  ;;  %v4340_v19 = vpop.f32.mrb[55].mxu1 }
 0x1e8   : > { %4994 = vst.msk [vmem:[%s6053_s27 + $0x160] sm:$0xff] %vm4949_vm2, %v4265_v18  ;;  %4996 = vst.msk [vmem:[%s6053_s27 + $0x170] sm:$0xff] %vm4949_vm2, %v4340_v19 }
 0x1ea   : > { %v5622_v20 = vpop.f32.mrb[56].mxu0  ;;  %v5627_v21 = vpop.f32.mrb[56].mxu1 }
 0x1eb   : > { %4999 = vst.msk [vmem:[%s6053_s27 + $0x188] sm:$0xff] %vm4949_vm2, %v5622_v20  ;;  %5001 = vst.msk [vmem:[%s6053_s27 + $0x198] sm:$0xff] %vm4949_vm2, %v5627_v21  ;;  %v4415_v22 = vpop.f32.mrb[57].mxu0  ;;  %v4490_v23 = vpop.f32.mrb[57].mxu1 }
 0x1ec   : > { %4998 = vst.msk [vmem:[%s6053_s27 + $0x180] sm:$0xff] %vm4949_vm2, %v4415_v22  ;;  %5000 = vst.msk [vmem:[%s6053_s27 + $0x190] sm:$0xff] %vm4949_vm2, %v4490_v23 }
 0x1ee   : > { %v5632_v24 = vpop.f32.mrb[58].mxu0  ;;  %v5637_v25 = vpop.f32.mrb[58].mxu1 }
 0x1ef   : > { %5003 = vst.msk [vmem:[%s6053_s27 + $0x1a8] sm:$0xff] %vm4949_vm2, %v5632_v24  ;;  %5005 = vst.msk [vmem:[%s6053_s27 + $0x1b8] sm:$0xff] %vm4949_vm2, %v5637_v25  ;;  %v4565_v26 = vpop.f32.mrb[59].mxu0  ;;  %v4640_v27 = vpop.f32.mrb[59].mxu1 }
 0x1f0   : > { %5002 = vst.msk [vmem:[%s6053_s27 + $0x1a0] sm:$0xff] %vm4949_vm2, %v4565_v26  ;;  %5004 = vst.msk [vmem:[%s6053_s27 + $0x1b0] sm:$0xff] %vm4949_vm2, %v4640_v27 }
 0x1f2   : > { %v5642_v28 = vpop.f32.mrb[60].mxu0  ;;  %v5647_v29 = vpop.f32.mrb[60].mxu1 }
 0x1f3   : > { %5007 = vst.msk [vmem:[%s6053_s27 + $0x1c8] sm:$0xff] %vm4949_vm2, %v5642_v28  ;;  %5009 = vst.msk [vmem:[%s6053_s27 + $0x1d8] sm:$0xff] %vm4949_vm2, %v5647_v29  ;;  %v4715_v30 = vpop.f32.mrb[61].mxu0  ;;  %v4790_v31 = vpop.f32.mrb[61].mxu1 }
 0x1f4   : > { %5006 = vst.msk [vmem:[%s6053_s27 + $0x1c0] sm:$0xff] %vm4949_vm2, %v4715_v30  ;;  %5008 = vst.msk [vmem:[%s6053_s27 + $0x1d0] sm:$0xff] %vm4949_vm2, %v4790_v31 }
 0x1f6   : > { %v5652_v32 = vpop.f32.mrb[62].mxu0  ;;  %v5657_v33 = vpop.f32.mrb[62].mxu1 }
 0x1f7   : > { %5011 = vst.msk [vmem:[%s6053_s27 + $0x1e8] sm:$0xff] %vm4949_vm2, %v5652_v32  ;;  %5013 = vst.msk [vmem:[%s6053_s27 + $0x1f8] sm:$0xff] %vm4949_vm2, %v5657_v33  ;;  %v4865_v35 = vpop.f32.mrb[63].mxu0  ;;  %v4940_v36 = vpop.f32.mrb[63].mxu1 }
 0x1f8   : > { %5010 = vst.msk [vmem:[%s6053_s27 + $0x1e0] sm:$0xff] %vm4949_vm2, %v4865_v35  ;;  %5012 = vst.msk [vmem:[%s6053_s27 + $0x1f0] sm:$0xff] %vm4949_vm2, %v4940_v36 }
 0x1f9 PF: > { %s13_s12 = sadd.s32 1, %s5674_s12  }
 0x1fa   : > { %p10_p4 = scmp.ge.s32.totalorder %s13_s12, 4  }
 0x1fc   :  { %12 = sbr.rel (!%p10_p4) target bundleno = 1 (0x1), region = 62 }

</bundles_post_ra>
